<compile_context>
chip_gen: v5e
topology: v5e:2x2
jax: 0.10.0
libtpu: 0.0.40
codegen_flags: <defaults>
</compile_context>

<pallas_src>
import jax
import jax.numpy as jnp
from jax.experimental import pallas as pl
from jax.experimental.pallas import tpu as pltpu


def _round_up(x, m):
    return (x + m - 1) // m * m


def _mlp_kernel(x_ref, w1_ref, b1_ref, w2_ref, b2_ref,
                w3_ref, b3_ref, w4_ref, b4_ref, o_ref):
    mm_dtype = w1_ref.dtype  # matmul operand dtype (bf16 by default)

    # Layer 1: Linear + ReLU  (MXU in mm_dtype, f32 accumulate, f32 epilogue)
    h = jnp.dot(x_ref[...], w1_ref[...], preferred_element_type=jnp.float32)
    h = jnp.maximum(h + b1_ref[...], 0.0)
    # Layer 2: Linear + ReLU
    h = jnp.dot(h.astype(mm_dtype), w2_ref[...],
                preferred_element_type=jnp.float32)
    h = jnp.maximum(h + b2_ref[...], 0.0)
    # Layer 3: Linear (no activation, matches reference)
    h = jnp.dot(h.astype(mm_dtype), w3_ref[...],
                preferred_element_type=jnp.float32) + b3_ref[...]
    # Output layer: Linear
    h = jnp.dot(h.astype(mm_dtype), w4_ref[...],
                preferred_element_type=jnp.float32) + b4_ref[...]
    o_ref[...] = h.astype(o_ref.dtype)


def net1_forward(x, params, *, tile_m_cap=256, matmul_dtype=jnp.bfloat16):
    """Run the fused MLP. x: (B, n_feature). params: dict of (in,out) weights."""
    x = x.astype(jnp.float32)  # mirrors `x = x.float()` in the PyTorch module
    B, n_feature = x.shape
    w1, b1 = params["w1"], params["b1"]
    w2, b2 = params["w2"], params["b2"]
    w3, b3 = params["w3"], params["b3"]
    w4, b4 = params["w4"], params["b4"]
    n_hidden = w1.shape[1]
    n_output = w4.shape[1]

    # Lane-pad every feature dimension to a multiple of 128.
    F = _round_up(n_feature, 128)
    H = _round_up(n_hidden, 128)
    O = _round_up(n_output, 128)

    # Bounded, 8-aligned batch tile; pad B up to a multiple of tile_m so the
    # grid has B_pad // tile_m steps (pipelined, megacore-shardable).
    tile_m = min(tile_m_cap, _round_up(B, 8))
    B_pad = _round_up(B, tile_m)
    grid = (B_pad // tile_m,)

    def pad2(a, rows, cols, dtype):
        r, c = a.shape
        return jnp.pad(a, ((0, rows - r), (0, cols - c))).astype(dtype)

    xp = pad2(x, B_pad, F, matmul_dtype)
    w1p = pad2(w1, F, H, matmul_dtype); b1p = pad2(b1, 1, H, jnp.float32)
    w2p = pad2(w2, H, H, matmul_dtype); b2p = pad2(b2, 1, H, jnp.float32)
    w3p = pad2(w3, H, H, matmul_dtype); b3p = pad2(b3, 1, H, jnp.float32)
    w4p = pad2(w4, H, O, matmul_dtype); b4p = pad2(b4, 1, O, jnp.float32)

    def full_spec(a):
        nd = a.ndim
        return pl.BlockSpec(a.shape, lambda i, _nd=nd: (0,) * _nd)

    out = pl.pallas_call(
        _mlp_kernel,
        out_shape=jax.ShapeDtypeStruct((B_pad, O), jnp.float32),
        grid_spec=pltpu.PrefetchScalarGridSpec(
            num_scalar_prefetch=0,
            grid=grid,
            in_specs=[
                pl.BlockSpec((tile_m, F), lambda i: (i, 0)),  # x tile (pipelined)
                full_spec(w1p), full_spec(b1p),
                full_spec(w2p), full_spec(b2p),
                full_spec(w3p), full_spec(b3p),
                full_spec(w4p), full_spec(b4p),
            ],
            out_specs=pl.BlockSpec((tile_m, O), lambda i: (i, 0)),
        ),
        compiler_params=pltpu.CompilerParams(
            dimension_semantics=("parallel",)),
    )(xp, w1p, b1p, w2p, b2p, w3p, b3p, w4p, b4p)

    # Strip batch and lane padding.
    return out[:B, :n_output]


def init_params(key, n_feature, n_hidden, n_output):
    """Deterministic init mimicking torch.nn.Linear default (U[-1/sqrt(fan_in), +])."""
    def linear(key, fan_in, fan_out):
        kw, kb = jax.random.split(key)
        bound = 1.0 / jnp.sqrt(fan_in)
        # Stored as (in, out) == transpose of PyTorch's (out, in) weight.
        w = jax.random.uniform(kw, (fan_in, fan_out), jnp.float32, -bound, bound)
        b = jax.random.uniform(kb, (1, fan_out), jnp.float32, -bound, bound)
        return w, b

    k1, k2, k3, k4 = jax.random.split(key, 4)
    w1, b1 = linear(k1, n_feature, n_hidden)
    w2, b2 = linear(k2, n_hidden, n_hidden)
    w3, b3 = linear(k3, n_hidden, n_hidden)
    w4, b4 = linear(k4, n_hidden, n_output)
    return dict(w1=w1, b1=b1, w2=w2, b2=b2, w3=w3, b3=b3, w4=w4, b4=b4)


def net1_reference(x, p, matmul_dtype=jnp.float32):
    """Pure-JAX reference of the same forward pass (optionally bf16 matmul ops)."""
    cast = lambda a: a.astype(matmul_dtype)
    h = x.astype(jnp.float32)
    h = jnp.maximum(jnp.dot(cast(h), cast(p["w1"]),
                            preferred_element_type=jnp.float32) + p["b1"], 0.0)
    h = jnp.maximum(jnp.dot(cast(h), cast(p["w2"]),
                            preferred_element_type=jnp.float32) + p["b2"], 0.0)
    h = jnp.dot(cast(h), cast(p["w3"]),
                preferred_element_type=jnp.float32) + p["b3"]
    h = jnp.dot(cast(h), cast(p["w4"]),
                preferred_element_type=jnp.float32) + p["b4"]
    return h


if __name__ == "__main__":
    # Small shapes consistent with the module's forward.
    batch, n_feature, n_hidden, n_output = 8, 16, 32, 8

    key = jax.random.PRNGKey(0)
    kx, kp = jax.random.split(key)
    x = jax.random.normal(kx, (batch, n_feature), jnp.float32)
    params = init_params(kp, n_feature, n_hidden, n_output)

    y = net1_forward(x, params)
    y = jax.block_until_ready(y)
    assert y.shape == (batch, n_output)

    # Tight check vs a reference using the same bf16-operand / f32-accumulate math.
    y_ref_bf16 = net1_reference(x, params, matmul_dtype=jnp.bfloat16)
    assert jnp.allclose(y, y_ref_bf16, atol=1e-2, rtol=1e-2), "mismatch vs bf16 reference"
    # Loose check vs the full-f32 PyTorch-equivalent forward.
    y_ref_f32 = net1_reference(x, params, matmul_dtype=jnp.float32)
    assert jnp.allclose(y, y_ref_f32, atol=5e-2, rtol=5e-2), "mismatch vs f32 reference"

    print("KERNEL_OK")
</pallas_src>

<mosaic_0001>
module attributes {stable_mosaic.version = 11 : i64} {
  func.func @_mlp_kernel(%arg0: i32, %arg1: memref<8x128xbf16, #tpu.memory_space<vmem>>, %arg2: memref<128x128xbf16, #tpu.memory_space<vmem>>, %arg3: memref<1x128xf32, #tpu.memory_space<vmem>>, %arg4: memref<128x128xbf16, #tpu.memory_space<vmem>>, %arg5: memref<1x128xf32, #tpu.memory_space<vmem>>, %arg6: memref<128x128xbf16, #tpu.memory_space<vmem>>, %arg7: memref<1x128xf32, #tpu.memory_space<vmem>>, %arg8: memref<128x128xbf16, #tpu.memory_space<vmem>>, %arg9: memref<1x128xf32, #tpu.memory_space<vmem>>, %arg10: memref<8x128xf32, #tpu.memory_space<vmem>>) attributes {dimension_semantics = [#tpu.dimension_semantics<parallel>], iteration_bounds = array<i64: 1>, scalar_prefetch = 0 : i64, scratch_operands = 0 : i64, tpu.core_type = #tpu.core_type<tc>, window_params = [{transform_indices = @transform_0, window_bounds = array<i64: 8, 128>}, {pipeline_mode = #tpu.pipeline_mode<synchronous>, transform_indices = @transform_1, window_bounds = array<i64: 128, 128>}, {pipeline_mode = #tpu.pipeline_mode<synchronous>, transform_indices = @transform_2, window_bounds = array<i64: 1, 128>}, {pipeline_mode = #tpu.pipeline_mode<synchronous>, transform_indices = @transform_3, window_bounds = array<i64: 128, 128>}, {pipeline_mode = #tpu.pipeline_mode<synchronous>, transform_indices = @transform_4, window_bounds = array<i64: 1, 128>}, {pipeline_mode = #tpu.pipeline_mode<synchronous>, transform_indices = @transform_5, window_bounds = array<i64: 128, 128>}, {pipeline_mode = #tpu.pipeline_mode<synchronous>, transform_indices = @transform_6, window_bounds = array<i64: 1, 128>}, {pipeline_mode = #tpu.pipeline_mode<synchronous>, transform_indices = @transform_7, window_bounds = array<i64: 128, 128>}, {pipeline_mode = #tpu.pipeline_mode<synchronous>, transform_indices = @transform_8, window_bounds = array<i64: 1, 128>}, {transform_indices = @transform_9, window_bounds = array<i64: 8, 128>}]} {
    %c0 = arith.constant 0 : index
    %c0_0 = arith.constant 0 : index
    %0 = vector.load %arg1[%c0, %c0_0] : memref<8x128xbf16, #tpu.memory_space<vmem>>, vector<8x128xbf16>
    %c0_1 = arith.constant 0 : index
    %c0_2 = arith.constant 0 : index
    %1 = vector.load %arg2[%c0_1, %c0_2] : memref<128x128xbf16, #tpu.memory_space<vmem>>, vector<128x128xbf16>
    %cst = arith.constant dense<0.000000e+00> : vector<8x128xf32>
    %2 = tpu.matmul %0, %1, %cst {dimension_numbers = #tpu.dot_dimension_numbers<[1], [0], [0], [1], [0, 0, 1, 1], [], []>} : vector<8x128xbf16>, vector<128x128xbf16>, vector<8x128xf32> -> vector<8x128xf32>
    %c0_3 = arith.constant 0 : index
    %c0_4 = arith.constant 0 : index
    %3 = vector.load %arg3[%c0_3, %c0_4] : memref<1x128xf32, #tpu.memory_space<vmem>>, vector<1x128xf32>
    %4 = vector.broadcast %3 : vector<1x128xf32> to vector<8x128xf32>
    %5 = arith.addf %2, %4 : vector<8x128xf32>
    %cst_5 = arith.constant 0.000000e+00 : f32
    %6 = vector.broadcast %cst_5 : f32 to vector<8x128xf32>
    %7 = arith.maximumf %5, %6 : vector<8x128xf32>
    %8 = arith.truncf %7 : vector<8x128xf32> to vector<8x128xbf16>
    %c0_6 = arith.constant 0 : index
    %c0_7 = arith.constant 0 : index
    %9 = vector.load %arg4[%c0_6, %c0_7] : memref<128x128xbf16, #tpu.memory_space<vmem>>, vector<128x128xbf16>
    %cst_8 = arith.constant dense<0.000000e+00> : vector<8x128xf32>
    %10 = tpu.matmul %8, %9, %cst_8 {dimension_numbers = #tpu.dot_dimension_numbers<[1], [0], [0], [1], [0, 0, 1, 1], [], []>} : vector<8x128xbf16>, vector<128x128xbf16>, vector<8x128xf32> -> vector<8x128xf32>
    %c0_9 = arith.constant 0 : index
    %c0_10 = arith.constant 0 : index
    %11 = vector.load %arg5[%c0_9, %c0_10] : memref<1x128xf32, #tpu.memory_space<vmem>>, vector<1x128xf32>
    %12 = vector.broadcast %11 : vector<1x128xf32> to vector<8x128xf32>
    %13 = arith.addf %10, %12 : vector<8x128xf32>
    %cst_11 = arith.constant 0.000000e+00 : f32
    %14 = vector.broadcast %cst_11 : f32 to vector<8x128xf32>
    %15 = arith.maximumf %13, %14 : vector<8x128xf32>
    %16 = arith.truncf %15 : vector<8x128xf32> to vector<8x128xbf16>
    %c0_12 = arith.constant 0 : index
    %c0_13 = arith.constant 0 : index
    %17 = vector.load %arg6[%c0_12, %c0_13] : memref<128x128xbf16, #tpu.memory_space<vmem>>, vector<128x128xbf16>
    %cst_14 = arith.constant dense<0.000000e+00> : vector<8x128xf32>
    %18 = tpu.matmul %16, %17, %cst_14 {dimension_numbers = #tpu.dot_dimension_numbers<[1], [0], [0], [1], [0, 0, 1, 1], [], []>} : vector<8x128xbf16>, vector<128x128xbf16>, vector<8x128xf32> -> vector<8x128xf32>
    %c0_15 = arith.constant 0 : index
    %c0_16 = arith.constant 0 : index
    %19 = vector.load %arg7[%c0_15, %c0_16] : memref<1x128xf32, #tpu.memory_space<vmem>>, vector<1x128xf32>
    %20 = vector.broadcast %19 : vector<1x128xf32> to vector<8x128xf32>
    %21 = arith.addf %18, %20 : vector<8x128xf32>
    %22 = arith.truncf %21 : vector<8x128xf32> to vector<8x128xbf16>
    %c0_17 = arith.constant 0 : index
    %c0_18 = arith.constant 0 : index
    %23 = vector.load %arg8[%c0_17, %c0_18] : memref<128x128xbf16, #tpu.memory_space<vmem>>, vector<128x128xbf16>
    %cst_19 = arith.constant dense<0.000000e+00> : vector<8x128xf32>
    %24 = tpu.matmul %22, %23, %cst_19 {dimension_numbers = #tpu.dot_dimension_numbers<[1], [0], [0], [1], [0, 0, 1, 1], [], []>} : vector<8x128xbf16>, vector<128x128xbf16>, vector<8x128xf32> -> vector<8x128xf32>
    %c0_20 = arith.constant 0 : index
    %c0_21 = arith.constant 0 : index
    %25 = vector.load %arg9[%c0_20, %c0_21] : memref<1x128xf32, #tpu.memory_space<vmem>>, vector<1x128xf32>
    %26 = vector.broadcast %25 : vector<1x128xf32> to vector<8x128xf32>
    %27 = arith.addf %24, %26 : vector<8x128xf32>
    %c0_22 = arith.constant 0 : index
    %c0_23 = arith.constant 0 : index
    %28 = vector.load %arg10[%c0_22, %c0_23] : memref<8x128xf32, #tpu.memory_space<vmem>>, vector<8x128xf32>
    tpu.vector_store %arg10[%c0_22, %c0_23], %27 {strides = array<i32>} : memref<8x128xf32, #tpu.memory_space<vmem>>, vector<8x128xf32>,
    return
  }
  func.func @transform_0(%arg0: i32) -> (i32, i32) {
    %c0_i32 = arith.constant 0 : i32
    %c0_i32_0 = arith.constant 0 : i32
    return %arg0, %c0_i32 : i32, i32
  }
  func.func @transform_1(%arg0: i32) -> (i32, i32) {
    %c0_i32 = arith.constant 0 : i32
    %c0_i32_0 = arith.constant 0 : i32
    %c0_i32_1 = arith.constant 0 : i32
    return %c0_i32, %c0_i32_0 : i32, i32
  }
  func.func @transform_2(%arg0: i32) -> (i32, i32) {
    %c0_i32 = arith.constant 0 : i32
    %c0_i32_0 = arith.constant 0 : i32
    %c0_i32_1 = arith.constant 0 : i32
    return %c0_i32, %c0_i32_0 : i32, i32
  }
  func.func @transform_3(%arg0: i32) -> (i32, i32) {
    %c0_i32 = arith.constant 0 : i32
    %c0_i32_0 = arith.constant 0 : i32
    %c0_i32_1 = arith.constant 0 : i32
    return %c0_i32, %c0_i32_0 : i32, i32
  }
  func.func @transform_4(%arg0: i32) -> (i32, i32) {
    %c0_i32 = arith.constant 0 : i32
    %c0_i32_0 = arith.constant 0 : i32
    %c0_i32_1 = arith.constant 0 : i32
    return %c0_i32, %c0_i32_0 : i32, i32
  }
  func.func @transform_5(%arg0: i32) -> (i32, i32) {
    %c0_i32 = arith.constant 0 : i32
    %c0_i32_0 = arith.constant 0 : i32
    %c0_i32_1 = arith.constant 0 : i32
    return %c0_i32, %c0_i32_0 : i32, i32
  }
  func.func @transform_6(%arg0: i32) -> (i32, i32) {
    %c0_i32 = arith.constant 0 : i32
    %c0_i32_0 = arith.constant 0 : i32
    %c0_i32_1 = arith.constant 0 : i32
    return %c0_i32, %c0_i32_0 : i32, i32
  }
  func.func @transform_7(%arg0: i32) -> (i32, i32) {
    %c0_i32 = arith.constant 0 : i32
    %c0_i32_0 = arith.constant 0 : i32
    %c0_i32_1 = arith.constant 0 : i32
    return %c0_i32, %c0_i32_0 : i32, i32
  }
  func.func @transform_8(%arg0: i32) -> (i32, i32) {
    %c0_i32 = arith.constant 0 : i32
    %c0_i32_0 = arith.constant 0 : i32
    %c0_i32_1 = arith.constant 0 : i32
    return %c0_i32, %c0_i32_0 : i32, i32
  }
  func.func @transform_9(%arg0: i32) -> (i32, i32) {
    %c0_i32 = arith.constant 0 : i32
    %c0_i32_0 = arith.constant 0 : i32
    return %arg0, %c0_i32 : i32, i32
  }
}

</mosaic_0001>

<bundles_post_ra>
// kernel: tpu_custom_call.1
= control target key start
LH: loop header
LB: loop body
LE: loop exit
PB: predicated region body
PF: predicated region fallthrough
CT: control target
= control target key end

     0   :  { %14 = vsyncpa [#allocation3], 0  ;;  %s871_s0 = inlined_call_operand.hbm [shape: bf16[8,128], index: 0, kind: input, shape index: {}]   ;;  %s872_s1 = inlined_call_operand.hbm [shape: bf16[128,128], index: 1, kind: input, shape index: {}]   ;;  %s873_s2 = inlined_call_operand.vmem [shape: f32[1,128], index: 2, kind: input, shape index: {}]   ;;  %s874_s3 = inlined_call_operand.hbm [shape: bf16[128,128], index: 3, kind: input, shape index: {}]   ;;  %s875_s4 = inlined_call_operand.vmem [shape: f32[1,128], index: 4, kind: input, shape index: {}]   ;;  %s876_s5 = inlined_call_operand.hbm [shape: bf16[128,128], index: 5, kind: input, shape index: {}]   ;;  %s877_s6 = inlined_call_operand.vmem [shape: f32[1,128], index: 6, kind: input, shape index: {}]   ;;  %s878_s7 = inlined_call_operand.hbm [shape: bf16[128,128], index: 7, kind: input, shape index: {}]   ;;  %s879_s8 = inlined_call_operand.vmem [shape: f32[1,128], index: 8, kind: input, shape index: {}]   ;;  %s880_s9 = inlined_call_operand.hbm [shape: f32[8,128], index: 9, kind: output, shape index: {}]  }
   0x1   :  { %15 = vsyncpa [#allocation6], 0 }
   0x2   :  { %16 = vsyncpa [#allocation9], 0  ;;  %s33_s11 = sshll.u32 %s872_s1, 4  ;;  %s34_s11 = int_to_ptr.hbm [resolvable:$true] %s33_s11 }
   0x3   :  { %17 = vsyncpa [#allocation4], 0  ;;  %s783_s12 = smov [#allocation5]   ;;  %s63_s16 = sshll.u32 %s876_s5, 4  ;;  %s64_s16 = int_to_ptr.hbm [resolvable:$true] %s63_s16 }
   0x4   :  { %s35_s13 = sshll.u32 %s783_s12, 4  ;;  %s784_s17 = smov 64   ;;  %s36_s13 = int_to_ptr.vmem [resolvable:$true] %s35_s13 }
   0x5   :  { %s785_s18 = smov 4   ;;  %s786_s19 = smov [#allocation8]  }
   0x6   :  { %41 = dma.hbm_to_vmem [thread:$0]  %s34_s11, 1024, %s36_s13, [#allocation6], %s784_s17, %s784_s17, %s785_s18  }
   0x7   :  { %s65_s20 = sshll.u32 %s786_s19, 4  ;;  %s23_s23 = sshll.u32 %s871_s0, 4  ;;  %s66_s20 = int_to_ptr.vmem [resolvable:$true] %s65_s20  ;;  %s24_s23 = int_to_ptr.hbm [resolvable:$true] %s23_s23 }
   0x8   :  { %71 = dma.hbm_to_vmem [thread:$0]  %s64_s16, 1024, %s66_s20, [#allocation9], %s784_s17, %s784_s17, %s785_s18  }
   0x9   :  { %s48_s25 = sshll.u32 %s874_s3, 4  ;;  %s787_s26 = smov [#allocation2]   ;;  %s49_s25 = int_to_ptr.hbm [resolvable:$true] %s48_s25 }
   0xa   :  { %s25_s27 = sshll.u32 %s787_s26, 4  ;;  %s788_s5 = smov [#allocation7]   ;;  %s26_s27 = int_to_ptr.vmem [resolvable:$true] %s25_s27 }
   0xb   :  { %28 = dma.hbm_to_vmem [thread:$0]  %s24_s23, 64, %s26_s27, [#allocation3]  }
   0xc   :  { %s50_s28 = sshll.u32 %s788_s5, 4  ;;  %s78_s10 = sshll.u32 %s878_s7, 4  ;;  %s51_s28 = int_to_ptr.vmem [resolvable:$true] %s50_s28  ;;  %s79_s10 = int_to_ptr.hbm [resolvable:$true] %s78_s10 }
   0xd   :  { %56 = dma.hbm_to_vmem [thread:$0]  %s49_s25, 1024, %s51_s28, [#allocation6], %s784_s17, %s784_s17, %s785_s18  }
   0xe   :  { %s789_s0 = smov [#allocation10]  }
   0xf   :  { %s80_s11 = sshll.u32 %s789_s0, 4  ;;  %s81_s11 = int_to_ptr.vmem [resolvable:$true] %s80_s11 }
  0x10   :  { %86 = dma.hbm_to_vmem [thread:$0]  %s79_s10, 1024, %s81_s11, [#allocation9], %s784_s17, %s784_s17, %s785_s18  }
  0x11   :  { %775 = dma.done.wait [#allocation3], 64  }
  0x12   :  { %776 = vsyncadd [#allocation3], 4294967232 }
  0x13   :  { %777 = dma.done.wait [#allocation6], 2048  }
  0x14   :  { %778 = vsyncadd [#allocation6], 4294965248 }
  0x15   :  { %779 = dma.done.wait [#allocation9], 2048  }
  0x16   :  { %780 = vsyncadd [#allocation9], 4294965248  ;;  %v594_v0 = vld [vmem:[#allocation5 + $0x38] sm:$0xff]  ;;  %v593_v1 = vld [vmem:[#allocation5 + $0x30] sm:$0xff]  ;;  %s790_s16 = smov [#allocation11]   ;;  %s447_s20 = sshll.u32 %s880_s9, 4  ;;  %s448_s20 = int_to_ptr.hbm [resolvable:$true] %s447_s20 }
  0x17   :  { %178 = vmatpush.bf16.msra.mxu0 %v594_v0  ;;  %v602_v2 = vld [vmem:[#allocation7 + $0x38] sm:$0xff]  ;;  %v601_v3 = vld [vmem:[#allocation7 + $0x30] sm:$0xff]  ;;  %v592_v4 = vld [vmem:[#allocation5 + $0x28] sm:$0xff]  ;;  %s445_s17 = sshll.u32 %s790_s16, 4  ;;  %s446_s17 = int_to_ptr.vmem [resolvable:$true] %s445_s17 }
  0x18   :  { %261 = vmatpush.bf16.msra.mxu1 %v602_v2  ;;  %v600_v5 = vld [vmem:[#allocation7 + $0x28] sm:$0xff]  ;;  %v591_v6 = vld [vmem:[#allocation5 + $0x20] sm:$0xff]  ;;  %v590_v8 = vld [vmem:[#allocation5 + $0x18] sm:$0xff] }
  0x19   :  { %v599_v7 = vld [vmem:[#allocation7 + $0x20] sm:$0xff]  ;;  %v598_v9 = vld [vmem:[#allocation7 + $0x18] sm:$0xff]  ;;  %v589_v10 = vld [vmem:[#allocation5 + $0x10] sm:$0xff] }
  0x1a   :  { %v597_v11 = vld [vmem:[#allocation7 + $0x10] sm:$0xff]  ;;  %v588_v12 = vld [vmem:[#allocation5 + $0x8] sm:$0xff]  ;;  %v587_v13 = vld [vmem:[#allocation5] sm:$0xff] }
  0x1b   :  { %179 = vmatpush.bf16.msra.mxu0 %v593_v1  ;;  %v109_v14 = vld [vmem:[#allocation2] sm:$0xf]  ;;  %v596_v15 = vld [vmem:[#allocation7 + $0x8] sm:$0xff]  ;;  %v595_v16 = vld [vmem:[#allocation7] sm:$0xff] }
  0x1c   :  { %262 = vmatpush.bf16.msra.mxu1 %v601_v3  ;;  %v610_v17 = vld [vmem:[#allocation8 + $0x38] sm:$0xff]  ;;  %v609_v18 = vld [vmem:[#allocation8 + $0x30] sm:$0xff]  ;;  %v608_v19 = vld [vmem:[#allocation8 + $0x28] sm:$0xff] }
  0x1d   :  { %344 = vmatpush.bf16.msra.mxu2 %v610_v17  ;;  %v607_v20 = vld [vmem:[#allocation8 + $0x20] sm:$0xff]  ;;  %v606_v21 = vld [vmem:[#allocation8 + $0x18] sm:$0xff]  ;;  %v605_v22 = vld [vmem:[#allocation8 + $0x10] sm:$0xff] }
  0x1e   :  { %v627_v23 = vld [vmem:[%s873_s2] ss:$0 sm:$0xff]  ;;  %v604_v29 = vld [vmem:[#allocation8 + $0x8] sm:$0xff]  ;;  %v603_v30 = vld [vmem:[#allocation8] sm:$0xff] }
  0x1f   :  { %180 = vmatpush.bf16.msra.mxu0 %v592_v4  ;;  %v618_v31 = vld [vmem:[#allocation10 + $0x38] sm:$0xff]  ;;  %v617_v32 = vld [vmem:[#allocation10 + $0x30] sm:$0xff]  ;;  %v616_v33 = vld [vmem:[#allocation10 + $0x28] sm:$0xff] }
  0x20   :  { %263 = vmatpush.bf16.msra.mxu1 %v600_v5  ;;  %426 = vmatpush.bf16.msra.mxu3 %v618_v31  ;;  %v615_v34 = vld [vmem:[#allocation10 + $0x20] sm:$0xff]  ;;  %v614_v35 = vld [vmem:[#allocation10 + $0x18] sm:$0xff]  ;;  %v613_v36 = vld [vmem:[#allocation10 + $0x10] sm:$0xff] }
  0x21   :  { %345 = vmatpush.bf16.msra.mxu2 %v609_v18  ;;  %v628_v37 = vld [vmem:[%s875_s4] ss:$0 sm:$0xff]  ;;  %v612_v38 = vld [vmem:[#allocation10 + $0x8] sm:$0xff]  ;;  %v611_v44 = vld [vmem:[#allocation10] sm:$0xff] }
  0x22   :  { %v629_v45 = vld [vmem:[%s877_s6] ss:$0 sm:$0xff] }
  0x23   :  { %181 = vmatpush.bf16.msra.mxu0 %v591_v6  ;;  %v630_v50 = vld [vmem:[%s879_s8] ss:$0 sm:$0xff] }
  0x24   :  { %264 = vmatpush.bf16.msra.mxu1 %v599_v7  ;;  %427 = vmatpush.bf16.msra.mxu3 %v617_v32 }
  0x25   :  { %346 = vmatpush.bf16.msra.mxu2 %v608_v19 }
  0x27   :  { %182 = vmatpush.bf16.msra.mxu0 %v590_v8 }
  0x28   :  { %265 = vmatpush.bf16.msra.mxu1 %v598_v9  ;;  %428 = vmatpush.bf16.msra.mxu3 %v616_v33 }
  0x29   :  { %347 = vmatpush.bf16.msra.mxu2 %v607_v20 }
  0x2b   :  { %183 = vmatpush.bf16.msra.mxu0 %v589_v10 }
  0x2c   :  { %266 = vmatpush.bf16.msra.mxu1 %v597_v11  ;;  %429 = vmatpush.bf16.msra.mxu3 %v615_v34 }
  0x2d   :  { %348 = vmatpush.bf16.msra.mxu2 %v606_v21 }
  0x2f   :  { %184 = vmatpush.bf16.msra.mxu0 %v588_v12 }
  0x30   :  { %267 = vmatpush.bf16.msra.mxu1 %v596_v15  ;;  %430 = vmatpush.bf16.msra.mxu3 %v614_v35 }
  0x31   :  { %349 = vmatpush.bf16.msra.mxu2 %v605_v22 }
  0x33   :  { %185 = vmatpush.bf16.msra.mxu0 %v587_v13 }
  0x34   :  { %268 = vmatpush.bf16.msra.mxu1 %v595_v16  ;;  %431 = vmatpush.bf16.msra.mxu3 %v613_v36 }
  0x35   :  { %350 = vmatpush.bf16.msra.mxu2 %v604_v29 }
  0x36   :  { %186 = vmatmul.bf16.vlgmr.msra.gmra.mxu0 %v109_v14 }
  0x38   :  { %432 = vmatpush.bf16.msra.mxu3 %v612_v38 }
  0x39   :  { %351 = vmatpush.bf16.msra.mxu2 %v603_v30 }
  0x3c   :  { %433 = vmatpush.bf16.msra.mxu3 %v611_v44 }
  0xb3   :  { %v187_v24 = vpop.f32.mrf.mxu0 }
  0xb4   :  { %v188_v25 = vadd.f32 %v627_v23, %v187_v24 }
  0xb6   :  { %v191_v26 = vmax.f32 %v188_v25, 0.0 }
  0xb8   :  { %v192_v27 = vpack.c.bf16 %v191_v26, %v191_v26 }
  0xba   :  { %269 = vmatmul.bf16.vlgmr.msra.gmra.mxu1 %v192_v27 }
  0xbb   :  { %v189_v28 = vpop.f32.mrf.mxu0 }
 0x137   :  { %v270_v39 = vpop.f32.mrf.mxu1 }
 0x138   :  { %v271_v40 = vadd.f32 %v628_v37, %v270_v39 }
 0x13a   :  { %v274_v41 = vmax.f32 %v271_v40, 0.0 }
 0x13c   :  { %v275_v42 = vpack.c.bf16 %v274_v41, %v274_v41 }
 0x13e   :  { %352 = vmatmul.bf16.vlgmr.msra.gmra.mxu2 %v275_v42 }
 0x13f   :  { %v272_v43 = vpop.f32.mrf.mxu1 }
 0x1c1   :  { %v353_v46 = vpop.f32.mrf.mxu2 }
 0x1c2   :  { %v354_v47 = vadd.f32 %v629_v45, %v353_v46 }
 0x1c4   :  { %v357_v48 = vpack.c.bf16 %v354_v47, %v354_v47 }
 0x1c6   :  { %434 = vmatmul.bf16.vlgmr.msra.gmra.mxu3 %v357_v48 }
 0x1c9   :  { %v355_v49 = vpop.f32.mrf.mxu2 }
 0x249   :  { %v435_v51 = vpop.f32.mrf.mxu3 }
 0x24a   :  { %v436_v52 = vadd.f32 %v630_v50, %v435_v51 }
 0x24c   :  { %439 = vst [vmem:[#allocation11] sm:$0xff] %v436_v52 }
 0x24d   :  { %450 = dma.vmem_to_hbm [thread:$0]  %s446_s17, 128, %s448_s20, [#allocation4]  }
 0x251   :  { %v437_v53 = vpop.f32.mrf.mxu3 }
 0x252   :  { %781 = dma.done.wait [#allocation4], 128  }
 0x253   :  { %782 = vsyncadd [#allocation4], 4294967168 }
 0x254   :  { %455 = vsyncpa [#allocation3], 1 }
 0x255   :  { %456 = vsyncpa [#allocation6], 1 }
 0x256   :  { %457 = vsyncpa [#allocation9], 1 }
 0x257   :  { %458 = vsyncpa [#allocation4], 1 }

</bundles_post_ra>
